<compile_context>
chip_gen: v7x
topology: tpu7x:2x2x1
jax: 0.10.0
libtpu: 0.0.40
codegen_flags: <defaults>
</compile_context>

<pallas_src>
import jax
import jax.numpy as jnp
from jax.experimental import pallas as pl
from jax.experimental.pallas import tpu as pltpu


def _round_up(x, m):
    return (x + m - 1) // m * m


def _make_conv_relu_kernel(tap_offsets, c_in_p, margin, out_width):
    """Build the per-batch kernel body.

    x_ref:    (C_in_p, P_in)      bf16  halo-padded, flat spatial, +/- margin
    w_ref:    (C_out_p, 9*C_in_p) bf16  conv weight, taps folded on contraction
    b_ref:    (C_out_p, 1)        f32
    o_ref:    (C_out_p, P_out)    bf16  flat output in padded coordinates
    slab_ref: (9*C_in_p, P_out)   bf16  VMEM im2col scratch
    """

    def kernel(x_ref, w_ref, b_ref, o_ref, slab_ref):
        # Build the 9 taps from the VMEM-resident tile with statically shifted
        # lane slices (in-kernel im2col; no HBM inflation).
        for t, d in enumerate(tap_offsets):
            s = margin + d
            slab_ref[t * c_in_p:(t + 1) * c_in_p, :] = x_ref[:, s:s + out_width]
        # One MXU contraction: (C_out_p x 9*C_in_p) @ (9*C_in_p x P_out),
        # f32 accumulation; bias + ReLU epilogue in f32; bf16 store.
        acc = jnp.dot(w_ref[...], slab_ref[...],
                      preferred_element_type=jnp.float32)
        o_ref[...] = jnp.maximum(acc + b_ref[...], 0.0).astype(o_ref.dtype)

    return kernel


def trt_module_forward(x, weight, bias):
    """Synthetic TRT-engine forward: conv3x3(stride=1, pad=1) + bias + relu, NCHW."""
    B, C_in, H, W = x.shape
    C_out, _, KH, KW = weight.shape
    assert (KH, KW) == (3, 3)

    P = (H + 2) * (W + 2)            # halo-padded flat spatial size
    margin = W + 3                   # max |tap offset| in flat coordinates
    C_in_p = _round_up(C_in, 16)     # bf16 sublane pack
    C_out_p = _round_up(C_out, 8)    # TODO(synk): pad to MXU width at production C_out
    KC_p = 9 * C_in_p
    P_out = _round_up(P, 128)                  # lane-dense output width
    P_in = _round_up(2 * margin + P_out, 128)  # input width incl. shift margins

    # Tap offsets in halo-padded flat coordinates, (kh, kw) row-major to match
    # the weight folding below.
    tap_offsets = [(kh - 1) * (W + 2) + (kw - 1)
                   for kh in range(3) for kw in range(3)]

    # --- wrapper glue (~1x HBM traffic; bf16 cast happens before the pad) ---
    xb = x.astype(jnp.bfloat16)
    xhalo = jnp.pad(xb, ((0, 0), (0, C_in_p - C_in), (1, 1), (1, 1)))
    xflat = xhalo.reshape(B, C_in_p, P)
    xs = jnp.pad(xflat, ((0, 0), (0, 0), (margin, P_in - P - margin)))

    # Weight: (C_out, C_in, 3, 3) -> (C_out, kh, kw, C_in) -> (C_out_p, 9*C_in_p),
    # tap-major / channel-minor, matching the slab layout built in the kernel.
    wt = jnp.transpose(weight, (0, 2, 3, 1)).reshape(C_out, 9, C_in)
    wt = jnp.pad(wt, ((0, C_out_p - C_out), (0, 0), (0, C_in_p - C_in)))
    w_flat = wt.reshape(C_out_p, KC_p).astype(jnp.bfloat16)

    b2 = jnp.pad(bias, (0, C_out_p - C_out)).reshape(C_out_p, 1)
    b2 = b2.astype(jnp.float32)

    # Generation-aware VMEM budget (v5e/v6e: 128 MiB, v7x: 64 MiB physical).
    try:
        vmem_cap = int(pltpu.get_tpu_info().vmem_capacity_bytes)
    except Exception:
        vmem_cap = 64 * 1024 * 1024
    block_bytes = (
        2 * C_in_p * P_in * 2        # double-buffered input blocks (bf16)
        + 2 * C_out_p * P_out * 2    # double-buffered output blocks (bf16)
        + C_out_p * KC_p * 2         # resident weight
        + C_out_p * 4                # resident bias
        + KC_p * P_out * 2           # im2col scratch slab
    )
    vmem_limit = min(vmem_cap // 2, max(4 * block_bytes, 16 * 1024 * 1024))
    if block_bytes > vmem_limit:
        # TODO(synk): halo-tiled spatial blocking + K-reduction grid axis for
        # image/channel sizes whose per-batch slab exceeds VMEM.
        raise ValueError("per-batch block does not fit the VMEM budget")

    kernel = _make_conv_relu_kernel(tap_offsets, C_in_p, margin, P_out)

    out_flat = pl.pallas_call(
        kernel,
        out_shape=jax.ShapeDtypeStruct((B, C_out_p, P_out), jnp.bfloat16),
        grid_spec=pltpu.PrefetchScalarGridSpec(
            num_scalar_prefetch=0,
            grid=(B,),
            in_specs=[
                pl.BlockSpec((pl.Squeezed(), C_in_p, P_in), lambda b: (b, 0, 0)),
                # weight / bias are grid-invariant (constant block index);
                # they stay VMEM-resident across the whole grid.
                pl.BlockSpec((C_out_p, KC_p), lambda b: (0, 0)),
                pl.BlockSpec((C_out_p, 1), lambda b: (0, 0)),
            ],
            out_specs=pl.BlockSpec(
                (pl.Squeezed(), C_out_p, P_out), lambda b: (b, 0, 0)
            ),
            scratch_shapes=[pltpu.VMEM((KC_p, P_out), jnp.bfloat16)],
        ),
        compiler_params=pltpu.CompilerParams(
            dimension_semantics=("parallel",),
            vmem_limit_bytes=int(vmem_limit),
        ),
    )(xs, w_flat, b2)

    # Keep only the valid interior (halo/padded positions hold garbage).
    out = out_flat[:, :C_out, :P].reshape(B, C_out, H + 2, W + 2)
    out = out[:, :, 1:-1, 1:-1]
    return out.astype(jnp.float32)


if __name__ == "__main__":
    key = jax.random.PRNGKey(0)
    kx, kw, kb = jax.random.split(key, 3)

    B, C_in, C_out, H, W = 2, 4, 8, 16, 16
    x = jax.random.normal(kx, (B, C_in, H, W), dtype=jnp.float32)
    weight = jax.random.normal(kw, (C_out, C_in, 3, 3), dtype=jnp.float32) * 0.1
    bias = jax.random.normal(kb, (C_out,), dtype=jnp.float32) * 0.1

    out = trt_module_forward(x, weight, bias)
    out = jax.block_until_ready(out)

    # Reference: f32 conv on the same bf16-rounded operands the kernel feeds
    # the MXU (kernel accumulates in f32; only the final store is bf16).
    xb = x.astype(jnp.bfloat16).astype(jnp.float32)
    wb = weight.astype(jnp.bfloat16).astype(jnp.float32)
    ref = jax.lax.conv_general_dilated(
        xb, wb, window_strides=(1, 1), padding=((1, 1), (1, 1)),
        dimension_numbers=("NCHW", "OIHW", "NCHW"),
        precision=jax.lax.Precision.HIGHEST,
    ) + bias.reshape(1, C_out, 1, 1)
    ref = jnp.maximum(ref, 0.0)

    assert out.shape == (B, C_out, H, W)
    assert out.dtype == jnp.float32
    assert jnp.allclose(out, ref, atol=1e-2, rtol=1e-2)

    print("KERNEL_OK")
</pallas_src>

<mosaic_0001>
module attributes {stable_mosaic.version = 11 : i64} {
  func.func @kernel(%arg0: i32, %arg1: memref<1x16x512xbf16, #tpu.memory_space<vmem>>, %arg2: memref<8x144xbf16, #tpu.memory_space<vmem>>, %arg3: memref<8x1xf32, #tpu.memory_space<vmem>>, %arg4: memref<1x8x384xbf16, #tpu.memory_space<vmem>>, %arg5: memref<144x384xbf16, #tpu.memory_space<vmem>>) attributes {dimension_semantics = [#tpu.dimension_semantics<parallel>], iteration_bounds = array<i64: 2>, scalar_prefetch = 0 : i64, scratch_operands = 1 : i64, tpu.core_type = #tpu.core_type<tc>, window_params = [{transform_indices = @transform_0, window_bounds = array<i64: 1, 16, 512>}, {pipeline_mode = #tpu.pipeline_mode<synchronous>, transform_indices = @transform_1, window_bounds = array<i64: 8, 144>}, {pipeline_mode = #tpu.pipeline_mode<synchronous>, transform_indices = @transform_2, window_bounds = array<i64: 8, 1>}, {transform_indices = @transform_3, window_bounds = array<i64: 1, 8, 384>}]} {
    %c0 = arith.constant 0 : index
    %c0_0 = arith.constant 0 : index
    %c0_1 = arith.constant 0 : index
    %0 = vector.load %arg1[%c0, %c0_0, %c0_1] : memref<1x16x512xbf16, #tpu.memory_space<vmem>>, vector<1x16x384xbf16>
    %1 = vector.shape_cast %0 : vector<1x16x384xbf16> to vector<16x384xbf16>
    %c0_2 = arith.constant 0 : index
    %c0_3 = arith.constant 0 : index
    %2 = vector.load %arg5[%c0_2, %c0_3] : memref<144x384xbf16, #tpu.memory_space<vmem>>, vector<16x384xbf16>
    tpu.vector_store %arg5[%c0_2, %c0_3], %1 {strides = array<i32>} : memref<144x384xbf16, #tpu.memory_space<vmem>>, vector<16x384xbf16>,
    %c0_4 = arith.constant 0 : index
    %c0_5 = arith.constant 0 : index
    %c1 = arith.constant 1 : index
    %3 = vector.load %arg1[%c0_4, %c0_5, %c1] : memref<1x16x512xbf16, #tpu.memory_space<vmem>>, vector<1x16x384xbf16>
    %4 = vector.shape_cast %3 : vector<1x16x384xbf16> to vector<16x384xbf16>
    %c16 = arith.constant 16 : index
    %c0_6 = arith.constant 0 : index
    %5 = vector.load %arg5[%c16, %c0_6] : memref<144x384xbf16, #tpu.memory_space<vmem>>, vector<16x384xbf16>
    tpu.vector_store %arg5[%c16, %c0_6], %4 {strides = array<i32>} : memref<144x384xbf16, #tpu.memory_space<vmem>>, vector<16x384xbf16>,
    %c0_7 = arith.constant 0 : index
    %c0_8 = arith.constant 0 : index
    %c2 = arith.constant 2 : index
    %6 = vector.load %arg1[%c0_7, %c0_8, %c2] : memref<1x16x512xbf16, #tpu.memory_space<vmem>>, vector<1x16x384xbf16>
    %7 = vector.shape_cast %6 : vector<1x16x384xbf16> to vector<16x384xbf16>
    %c32 = arith.constant 32 : index
    %c0_9 = arith.constant 0 : index
    %8 = vector.load %arg5[%c32, %c0_9] : memref<144x384xbf16, #tpu.memory_space<vmem>>, vector<16x384xbf16>
    tpu.vector_store %arg5[%c32, %c0_9], %7 {strides = array<i32>} : memref<144x384xbf16, #tpu.memory_space<vmem>>, vector<16x384xbf16>,
    %c0_10 = arith.constant 0 : index
    %c0_11 = arith.constant 0 : index
    %c18 = arith.constant 18 : index
    %9 = vector.load %arg1[%c0_10, %c0_11, %c18] : memref<1x16x512xbf16, #tpu.memory_space<vmem>>, vector<1x16x384xbf16>
    %10 = vector.shape_cast %9 : vector<1x16x384xbf16> to vector<16x384xbf16>
    %c48 = arith.constant 48 : index
    %c0_12 = arith.constant 0 : index
    %11 = vector.load %arg5[%c48, %c0_12] : memref<144x384xbf16, #tpu.memory_space<vmem>>, vector<16x384xbf16>
    tpu.vector_store %arg5[%c48, %c0_12], %10 {strides = array<i32>} : memref<144x384xbf16, #tpu.memory_space<vmem>>, vector<16x384xbf16>,
    %c0_13 = arith.constant 0 : index
    %c0_14 = arith.constant 0 : index
    %c19 = arith.constant 19 : index
    %12 = vector.load %arg1[%c0_13, %c0_14, %c19] : memref<1x16x512xbf16, #tpu.memory_space<vmem>>, vector<1x16x384xbf16>
    %13 = vector.shape_cast %12 : vector<1x16x384xbf16> to vector<16x384xbf16>
    %c64 = arith.constant 64 : index
    %c0_15 = arith.constant 0 : index
    %14 = vector.load %arg5[%c64, %c0_15] : memref<144x384xbf16, #tpu.memory_space<vmem>>, vector<16x384xbf16>
    tpu.vector_store %arg5[%c64, %c0_15], %13 {strides = array<i32>} : memref<144x384xbf16, #tpu.memory_space<vmem>>, vector<16x384xbf16>,
    %c0_16 = arith.constant 0 : index
    %c0_17 = arith.constant 0 : index
    %c20 = arith.constant 20 : index
    %15 = vector.load %arg1[%c0_16, %c0_17, %c20] : memref<1x16x512xbf16, #tpu.memory_space<vmem>>, vector<1x16x384xbf16>
    %16 = vector.shape_cast %15 : vector<1x16x384xbf16> to vector<16x384xbf16>
    %c80 = arith.constant 80 : index
    %c0_18 = arith.constant 0 : index
    %17 = vector.load %arg5[%c80, %c0_18] : memref<144x384xbf16, #tpu.memory_space<vmem>>, vector<16x384xbf16>
    tpu.vector_store %arg5[%c80, %c0_18], %16 {strides = array<i32>} : memref<144x384xbf16, #tpu.memory_space<vmem>>, vector<16x384xbf16>,
    %c0_19 = arith.constant 0 : index
    %c0_20 = arith.constant 0 : index
    %c36 = arith.constant 36 : index
    %18 = vector.load %arg1[%c0_19, %c0_20, %c36] : memref<1x16x512xbf16, #tpu.memory_space<vmem>>, vector<1x16x384xbf16>
    %19 = vector.shape_cast %18 : vector<1x16x384xbf16> to vector<16x384xbf16>
    %c96 = arith.constant 96 : index
    %c0_21 = arith.constant 0 : index
    %20 = vector.load %arg5[%c96, %c0_21] : memref<144x384xbf16, #tpu.memory_space<vmem>>, vector<16x384xbf16>
    tpu.vector_store %arg5[%c96, %c0_21], %19 {strides = array<i32>} : memref<144x384xbf16, #tpu.memory_space<vmem>>, vector<16x384xbf16>,
    %c0_22 = arith.constant 0 : index
    %c0_23 = arith.constant 0 : index
    %c37 = arith.constant 37 : index
    %21 = vector.load %arg1[%c0_22, %c0_23, %c37] : memref<1x16x512xbf16, #tpu.memory_space<vmem>>, vector<1x16x384xbf16>
    %22 = vector.shape_cast %21 : vector<1x16x384xbf16> to vector<16x384xbf16>
    %c112 = arith.constant 112 : index
    %c0_24 = arith.constant 0 : index
    %23 = vector.load %arg5[%c112, %c0_24] : memref<144x384xbf16, #tpu.memory_space<vmem>>, vector<16x384xbf16>
    tpu.vector_store %arg5[%c112, %c0_24], %22 {strides = array<i32>} : memref<144x384xbf16, #tpu.memory_space<vmem>>, vector<16x384xbf16>,
    %c0_25 = arith.constant 0 : index
    %c0_26 = arith.constant 0 : index
    %c38 = arith.constant 38 : index
    %24 = vector.load %arg1[%c0_25, %c0_26, %c38] : memref<1x16x512xbf16, #tpu.memory_space<vmem>>, vector<1x16x384xbf16>
    %25 = vector.shape_cast %24 : vector<1x16x384xbf16> to vector<16x384xbf16>
    %c128 = arith.constant 128 : index
    %c0_27 = arith.constant 0 : index
    %26 = vector.load %arg5[%c128, %c0_27] : memref<144x384xbf16, #tpu.memory_space<vmem>>, vector<16x384xbf16>
    tpu.vector_store %arg5[%c128, %c0_27], %25 {strides = array<i32>} : memref<144x384xbf16, #tpu.memory_space<vmem>>, vector<16x384xbf16>,
    %c0_28 = arith.constant 0 : index
    %c0_29 = arith.constant 0 : index
    %27 = vector.load %arg2[%c0_28, %c0_29] : memref<8x144xbf16, #tpu.memory_space<vmem>>, vector<8x144xbf16>
    %c0_30 = arith.constant 0 : index
    %c0_31 = arith.constant 0 : index
    %28 = vector.load %arg5[%c0_30, %c0_31] : memref<144x384xbf16, #tpu.memory_space<vmem>>, vector<144x384xbf16>
    %cst = arith.constant dense<0.000000e+00> : vector<8x384xf32>
    %29 = tpu.matmul %27, %28, %cst {dimension_numbers = #tpu.dot_dimension_numbers<[1], [0], [0], [1], [0, 0, 1, 1], [], []>} : vector<8x144xbf16>, vector<144x384xbf16>, vector<8x384xf32> -> vector<8x384xf32>
    %c0_32 = arith.constant 0 : index
    %c0_33 = arith.constant 0 : index
    %30 = vector.load %arg3[%c0_32, %c0_33] : memref<8x1xf32, #tpu.memory_space<vmem>>, vector<8x1xf32>
    %31 = vector.broadcast %30 : vector<8x1xf32> to vector<8x384xf32>
    %32 = arith.addf %29, %31 : vector<8x384xf32>
    %cst_34 = arith.constant 0.000000e+00 : f32
    %33 = vector.broadcast %cst_34 : f32 to vector<8x384xf32>
    %34 = arith.maximumf %32, %33 : vector<8x384xf32>
    %35 = arith.truncf %34 : vector<8x384xf32> to vector<8x384xbf16>
    %c0_35 = arith.constant 0 : index
    %c0_36 = arith.constant 0 : index
    %c0_37 = arith.constant 0 : index
    %36 = vector.load %arg4[%c0_35, %c0_36, %c0_37] : memref<1x8x384xbf16, #tpu.memory_space<vmem>>, vector<1x8x384xbf16>
    %37 = vector.shape_cast %36 : vector<1x8x384xbf16> to vector<8x384xbf16>
    %38 = vector.shape_cast %35 : vector<8x384xbf16> to vector<1x8x384xbf16>
    tpu.vector_store %arg4[%c0_35, %c0_36, %c0_37], %38 {strides = array<i32>} : memref<1x8x384xbf16, #tpu.memory_space<vmem>>, vector<1x8x384xbf16>,
    return
  }
  func.func @transform_0(%arg0: i32) -> (i32, i32, i32) {
    %c0_i32 = arith.constant 0 : i32
    %c0_i32_0 = arith.constant 0 : i32
    %c0_i32_1 = arith.constant 0 : i32
    return %arg0, %c0_i32, %c0_i32_0 : i32, i32, i32
  }
  func.func @transform_1(%arg0: i32) -> (i32, i32) {
    %c0_i32 = arith.constant 0 : i32
    %c0_i32_0 = arith.constant 0 : i32
    %c0_i32_1 = arith.constant 0 : i32
    return %c0_i32, %c0_i32_0 : i32, i32
  }
  func.func @transform_2(%arg0: i32) -> (i32, i32) {
    %c0_i32 = arith.constant 0 : i32
    %c0_i32_0 = arith.constant 0 : i32
    %c0_i32_1 = arith.constant 0 : i32
    return %c0_i32, %c0_i32_0 : i32, i32
  }
  func.func @transform_3(%arg0: i32) -> (i32, i32, i32) {
    %c0_i32 = arith.constant 0 : i32
    %c0_i32_0 = arith.constant 0 : i32
    %c0_i32_1 = arith.constant 0 : i32
    return %arg0, %c0_i32, %c0_i32_0 : i32, i32, i32
  }
}

</mosaic_0001>

<bundles_post_ra>
// kernel: tpu_custom_call.1
= control target key start
LH: loop header
LB: loop body
LE: loop exit
PB: predicated region body
PF: predicated region fallthrough
CT: control target
= control target key end

     0   :  { %8 = vsyncpa [#allocation4], 0  ;;  %s1183_s0 = inlined_call_operand.hbm [shape: bf16[2,16,512], index: 0, kind: input, shape index: {}]   ;;  %s1184_s1 = inlined_call_operand.vmem [shape: bf16[8,144], index: 1, kind: input, shape index: {}]   ;;  %s1185_s2 = inlined_call_operand.vmem [shape: f32[8,1], index: 2, kind: input, shape index: {}]   ;;  %s1186_s3 = inlined_call_operand.hbm [shape: bf16[2,8,384], index: 3, kind: output, shape index: {}]  }
   0x1   :  { %10 = vsyncpa [#allocation4 + $0x1], 0 }
   0x2   :  { %11 = vsyncpa [#allocation5], 0 }
   0x3   :  { %13 = vsyncpa [#allocation5 + $0x1], 0  ;;  %s1000_s12 = smov 0   ;;  %s1002_s13 = smov 0  }
   0x4   :  { %s1004_s14 = smov 0   ;;  %s1006_s15 = smov 0  }
   0x5 LB: > { %s1021_s16 = sadd.s32 4294967295, %s965_s15   ;;  %s745_s17 = sadd.s32 4294967294, %s965_s15   ;;  %s965_s15 = sphi %s1006_s15, %s1199_s15   ;;  %s961_s14 = sphi %s1004_s14, %s1198_s14   ;;  %s957_s13 = sphi %s1002_s13, %s1197_s13   ;;  %s953_s12 = sphi %s1000_s12, %s1196_s12  }
   0x6   : > { %s1025_s18 = sadd.s32 1, %s965_s15   ;;  %s26_s19 = sadd.s32 1, %s961_s14 }
   0x7   : > { %s23_s20 = ssub.s32 %s965_s15, %s1025_s18  ;;  %p33_p0 = scmp.ne.s32.totalorder %s961_s14, %s957_s13 }
   0x8   : > { %p24_p1 = scmp.eq.s32.totalorder %s23_s20, 0  ;;  %p34_p2 = scmp.eq.s32.totalorder %s965_s15, 0 }
   0x9   : > { %p39_p3 = scmp.ne.s32.totalorder %s957_s13, %s953_s12  ;;  %p40_p4 = scmp.eq.s32.totalorder %s1021_s16, 0 }
   0xa   : > { %s1037_s21 = scalar_select %p24_p1, %s961_s14, %s26_s19  }
   0xb   : > { %p1039_p5 = por %p34_p2, %p33_p0  ;;  %p1043_p6 = por %p40_p4, %p39_p3 }
   0xc   : > { %p105_p7 = scmp.eq.s32.totalorder %s1021_s16, 1  ;;  %p111_p8 = scmp.eq.s32.totalorder %s745_s17, 1 }
   0xd   : > { %p814_p10 = scmp.lt.s32.totalorder %s965_s15, 2  ;;  %s137_s26 = sand.u32 1, %s961_s14  }
   0xe   : > { %p1050_p11 = por %p105_p7, %p33_p0  ;;  %p1054_p12 = por %p111_p8, %p39_p3 }
   0xf   : > { %s797_s27 = sshll.u32 %s965_s15, 9  ;;  %s748_s28 = sshll.u32 %s137_s26, 5 }
  0x10   : > { %s1190_s24 = scalar_select %p1050_p11, 1, 0 }
  0x11   : > { %s1191_s25 = scalar_select %p1054_p12, 1, 0 }
  0x12   : > { %s1063_s4 = scalar_lea.hbm %s1183_s0, %s797_s27  ;;  %s141_s5 = scalar_lea.vmem [#allocation3], %s748_s28 }
  0x13   : > { %s148_s6 = sshll.u32 %s141_s5, 4  ;;  %p1067_p13 = pnand %p814_p10, %p1039_p5  ;;  %s1071_s6 = int_to_ptr.vmem [resolvable:$true] %s148_s6 }
  0x14   : > { %s1073_s8 = scalar_lea.sflag [#allocation4], %s137_s26  ;;  %s869_s9 = scalar_lea.hbm %s1063_s4, 512 }
  0x15   : > { %p870_p0 = scmp.ne.s32.totalorder %s1063_s4, %s869_s9  ;;  %p871_p1 = pneg %p1067_p13 }
  0x16   : > { %s874_s17 = scalar_lea.hbm %s1183_s0, 1024  ;;  %p875_p4 = scmp.lt.u32.totalorder %s1063_s4, %s1183_s0 }
  0x17   : > { %p872_p2 = pnand %p871_p1, %p870_p0  ;;  %p876_p5 = scmp.lt.u32.totalorder %s874_s17, %s869_s9 }
  0x18   : > { %p878_p8 = scmp.lt.u32.totalorder %s869_s9, %s1063_s4 }
  0x19   : > { %p873_p3 = pneg %p872_p2  ;;  %p877_p7 = por %p876_p5, %p875_p4 }
  0x1b   : > { %p879_p10 = por %p878_p8, %p877_p7 }
  0x1d   : > { %p880_p9 = pnand %p879_p10, %p873_p3 }
  0x1f   : > { %883 = shalt.err (!%p880_p9)
}
  0x20   : > { %s884_s22 = scalar_lea.vmem %s1071_s6, 512  ;;  %s967_s26 = smov [#allocation3]  }
  0x21   : > { %p885_p0 = scmp.ne.s32.totalorder %s1071_s6, %s884_s22  ;;  %s889_s27 = sshll.u32 %s967_s26, 4  ;;  %s890_s27 = int_to_ptr.vmem [resolvable:$false] %s889_s27 }
  0x22   : > { %s891_s28 = scalar_lea.vmem %s890_s27, 1024  ;;  %p892_p11 = scmp.lt.s32.totalorder %s1071_s6, %s890_s27 }
  0x23   : > { %p887_p2 = pnand %p885_p0, %p871_p1  ;;  %p893_p4 = scmp.lt.s32.totalorder %s891_s28, %s884_s22 }
  0x25   : > { %p888_p12 = pneg %p887_p2  ;;  %p894_p5 = por %p893_p4, %p892_p11 }
  0x27   : > { %p895_p7 = pnand %p894_p5, %p888_p12 }
  0x29   : > { %898 = shalt.err (!%p895_p7)
}
  0x2a   : > { %s968_s29 = smov 256   ;;  %s969_s30 = smov 16  }
  0x2b   : > { %809 = dma.hbm_to_vmem [thread:$0]  (!%p1067_p13), %s1063_s4, 512, %s1071_s6, %s1073_s8, %s968_s29, %s968_s29, %s969_s30  }
  0x2c   : > { %p751_p9 = scmp.ge.s32.totalorder %s965_s15, 1  ;;  %p156_p1 = scmp.lt.s32.totalorder %s965_s15, 3 }
  0x2e   : > { %p157_p3 = pnand %p751_p9, %p156_p1 }
  0x2f   : > { %s1104_s5 = sand.u32 (!%p157_p3), 1, %s957_s13  }
  0x30   : > { %160 = sbr.rel (%p157_p3) target bundleno = 470 (0x1d6), region = 32  ;;  %s752_s9 = sshll.u32 (!%p157_p3), %s1104_s5, 5 }
  0x31   : > { %s163_s10 = scalar_lea.sflag (!%p157_p3), [#allocation4], %s1104_s5  ;;  %s166_s11 = scalar_lea.vmem (!%p157_p3), [#allocation3], %s752_s9 }
  0x37   : > { %944 = dma.done.wait (%p1043_p6), %s163_s10, 512  }
  0x38   : > { %946 = vsyncadd (%p1043_p6), %s163_s10, 4294966784  ;;  %v970_v0 = vmov 0   ;;  %v860_v1 = vld [vmem:[%s166_s11 + $0x4] ss:$16 sps:$4 sm:$0xff]   ;;  %v862_v2 = vld [vmem:[%s166_s11] ss:$16 sps:$4 sm:$0xff]  }
  0x39   : > { %602 = vmatprep.subr.bf16.mxu1 %v970_v0  ;;  %859 = vset.pattern.permute.xlu0 %v970_v0  ;;  %s971_s4 = smov 127   ;;  %v863_v3 = vld [vmem:[%s166_s11 + $0x8] ss:$16 sps:$4 sm:$0xff]   ;;  %v865_v4 = vld [vmem:[%s166_s11 + $0xc] ss:$16 sps:$4 sm:$0xff]   ;;  %s972_s23 = smov 126  }
  0x3a   : > { %235 = vrot.lane.b32.xlu0 %v860_v1, %s971_s4  ;;  %561 = vmatprep.subr.bf16.mxu0 %v860_v1  ;;  %v866_v5 = vld [vmem:[%s166_s11 + $0x8] ss:$16 sps:$4 sm:$0xff]   ;;  %s973_s6 = smov 110   ;;  %s974_s7 = smov 109   ;;  %v1118_v6 = vld [vmem:[%s1184_s1] sm:$0xff]  ;;  %vm557_vm0 = vcmask 130048  }
  0x3b   : > { %233 = vrot.lane.b32.xlu1 %v862_v2, %s971_s4  ;;  %562 = vmatpush1.bf16.msra.mxu0 %v862_v2  ;;  %s975_s8 = smov 108   ;;  %s976_s17 = smov 92   ;;  %v789_v7 = vcombine.high %v1118_v6, %v1118_v6  ;;  %v545_v8 = vld [vmem:[%s1185_s2] sm:$0xff]  ;;  %vm241_vm1 = vcmask 1039360   ;;  %vm279_vm2 = vcmask 1031168   ;;  %vm317_vm3 = vcmask 900096  }
  0x3c   : > { %603 = vmatpush1.bf16.msra.mxu1 %v866_v5  ;;  %s977_s19 = smov 91   ;;  %s978_s26 = smov 90   ;;  %vm355_vm4 = vcmask 891904   ;;  %vm393_vm5 = vcmask 883712   ;;  %vm431_vm6 = vcmask 752640   ;;  %vm469_vm7 = vcmask 744448  }
  0x3d   : > { %604 = vmatprep.subr.bf16.mxu1 %v970_v0  ;;  %790 = vmatprep.mubr.msk.bf16.mxu0 %vm557_vm0, %v789_v7  ;;  %vm507_vm8 = vcmask 736256   ;;  %s800_s29 = smul.u32 12, %s1104_s5  ;;  %p1193_p11 = scmp.ne.s32.totalorder %s1190_s24, 0 }
  0x3e   : > { %237 = vrot.lane.b32.xlu0 %v863_v3, %s971_s4  ;;  %791 = vmatprep.mubr.msk.bf16.mxu1 %vm557_vm0, %v789_v7  ;;  %s801_s30 = smul.u32 192, %s1021_s16  ;;  %s661_s16 = scalar_lea.sflag [#allocation5], %s1104_s5 }
  0x3f   : > { %239 = vrot.lane.b32.xlu1 %v865_v4, %s971_s4  ;;  %s188_s9 = scalar_lea.vmem [#allocation6], %s800_s29 }
  0x40   : > { %s675_s10 = sshll.u32 %s188_s9, 4  ;;  %s1141_s10 = int_to_ptr.vmem [resolvable:$true] %s675_s10 }
  0x42   : > { %273 = vrot.lane.b32.xlu0 %v860_v1, %s972_s23 }
  0x43   : > { %275 = vrot.lane.b32.xlu1 %v863_v3, %s972_s23 }
  0x46   : > { %271 = vrot.lane.b32.xlu0 %v862_v2, %s972_s23 }
  0x47   : > { %277 = vrot.lane.b32.xlu1 %v865_v4, %s972_s23  ;;  %s1139_s23 = scalar_lea.hbm %s1186_s3, %s801_s30 }
  0x4a   : > { %311 = vrot.lane.b32.xlu0 %v860_v1, %s973_s6 }
  0x4b   : > { %313 = vrot.lane.b32.xlu1 %v863_v3, %s973_s6 }
  0x4e   : > { %309 = vrot.lane.b32.xlu0 %v862_v2, %s973_s6 }
  0x4f   : > { %315 = vrot.lane.b32.xlu1 %v865_v4, %s973_s6  ;;  %s899_s6 = scalar_lea.vmem %s1141_s10, 192 }
  0x50   : > { %p900_p6 = scmp.ne.s32.totalorder %s1141_s10, %s899_s6 }
  0x52   : > { %349 = vrot.lane.b32.xlu0 %v860_v1, %s974_s7  ;;  %p901_p12 = pnand %p900_p6, %p1193_p11 }
  0x53   : > { %351 = vrot.lane.b32.xlu1 %v863_v3, %s974_s7 }
  0x54   : > { %p902_p13 = pneg %p901_p12 }
  0x56   : > { %347 = vrot.lane.b32.xlu0 %v862_v2, %s974_s7 }
  0x57   : > { %353 = vrot.lane.b32.xlu1 %v865_v4, %s974_s7  ;;  %s979_s7 = smov [#allocation6]  }
  0x5a   : > { %387 = vrot.lane.b32.xlu0 %v860_v1, %s975_s8 }
  0x5b   : > { %389 = vrot.lane.b32.xlu1 %v863_v3, %s975_s8 }
  0x5e   : > { %385 = vrot.lane.b32.xlu0 %v862_v2, %s975_s8 }
  0x5f   : > { %391 = vrot.lane.b32.xlu1 %v865_v4, %s975_s8  ;;  %s903_s8 = sshll.u32 %s979_s7, 4  ;;  %s904_s8 = int_to_ptr.vmem [resolvable:$false] %s903_s8 }
  0x60   : > { %p906_p8 = scmp.lt.s32.totalorder %s1141_s10, %s904_s8 }
  0x62   : > { %425 = vrot.lane.b32.xlu0 %v860_v1, %s976_s17 }
  0x63   : > { %427 = vrot.lane.b32.xlu1 %v863_v3, %s976_s17 }
  0x66   : > { %423 = vrot.lane.b32.xlu0 %v862_v2, %s976_s17 }
  0x67   : > { %429 = vrot.lane.b32.xlu1 %v865_v4, %s976_s17  ;;  %s905_s17 = scalar_lea.vmem %s904_s8, 384 }
  0x68   : > { %p907_p10 = scmp.lt.s32.totalorder %s905_s17, %s899_s6 }
  0x6a   : > { %463 = vrot.lane.b32.xlu0 %v860_v1, %s977_s19  ;;  %p908_p0 = por %p907_p10, %p906_p8 }
  0x6b   : > { %465 = vrot.lane.b32.xlu1 %v863_v3, %s977_s19 }
  0x6c   : > { %p909_p2 = pnand %p908_p0, %p902_p13 }
  0x6e   : > { %461 = vrot.lane.b32.xlu0 %v862_v2, %s977_s19 }
  0x6f   : > { %467 = vrot.lane.b32.xlu1 %v865_v4, %s977_s19 }
  0x72   : > { %501 = vrot.lane.b32.xlu0 %v860_v1, %s978_s26  ;;  %v788_v1 = vcombine.low %v1118_v6, %v1118_v6 }
  0x73   : > { %503 = vrot.lane.b32.xlu1 %v863_v3, %s978_s26 }
  0x76   : > { %499 = vrot.lane.b32.xlu0 %v862_v2, %s978_s26 }
  0x77   : > { %505 = vrot.lane.b32.xlu1 %v865_v4, %s978_s26 }
  0x7a   : > { %548 = vperm.xlu0 %859, %v545_v8  }
  0xac   : > { %v236_v9 = vpop.permute.xlu0 %235 }
  0xad   : > { %v234_v10 = vpop.permute.xlu1 %233 }
  0xae   : > { %v242_v15 = vsel %vm241_vm1, %v234_v10, %v236_v9 }
  0xb0   : > { %v238_v11 = vpop.permute.xlu0 %237 }
  0xb1   : > { %v240_v12 = vpop.permute.xlu1 %239  ;;  %v243_v13 = vsel %vm241_vm1, %v236_v9, %v238_v11 }
  0xb2   : > { %563 = vmatprep.subr.bf16.mxu0 %v243_v13  ;;  %v244_v14 = vsel %vm241_vm1, %v238_v11, %v240_v12 }
  0xb3   : > { %605 = vmatpush1.bf16.msra.mxu1 %v244_v14  ;;  %564 = vmatpush1.bf16.msra.mxu0 %v242_v15 }
  0xb4   : > { %v274_v16 = vpop.permute.xlu0 %273  ;;  %606 = vmatprep.subr.bf16.mxu1 %v970_v0 }
  0xb5   : > { %v276_v17 = vpop.permute.xlu1 %275 }
  0xb6   : > { %v281_v18 = vsel %vm279_vm2, %v274_v16, %v276_v17 }
  0xb7   : > { %565 = vmatprep.subr.bf16.mxu0 %v281_v18 }
  0xb8   : > { %v272_v19 = vpop.permute.xlu0 %271 }
  0xb9   : > { %v278_v20 = vpop.permute.xlu1 %277  ;;  %v280_v21 = vsel %vm279_vm2, %v272_v19, %v274_v16 }
  0xba   : > { %566 = vmatpush1.bf16.msra.mxu0 %v280_v21  ;;  %v282_v22 = vsel %vm279_vm2, %v276_v17, %v278_v20 }
  0xbb   : > { %607 = vmatpush1.bf16.msra.mxu1 %v282_v22 }
  0xbc   : > { %v312_v23 = vpop.permute.xlu0 %311  ;;  %608 = vmatprep.subr.bf16.mxu1 %v970_v0 }
  0xbd   : > { %v314_v24 = vpop.permute.xlu1 %313 }
  0xbe   : > { %v319_v25 = vsel %vm317_vm3, %v312_v23, %v314_v24 }
  0xbf   : > { %567 = vmatprep.subr.bf16.mxu0 %v319_v25 }
  0xc0   : > { %v310_v26 = vpop.permute.xlu0 %309 }
  0xc1   : > { %v316_v27 = vpop.permute.xlu1 %315  ;;  %v318_v28 = vsel %vm317_vm3, %v310_v26, %v312_v23 }
  0xc2   : > { %568 = vmatpush1.bf16.msra.mxu0 %v318_v28  ;;  %v320_v29 = vsel %vm317_vm3, %v314_v24, %v316_v27 }
  0xc3   : > { %609 = vmatpush1.bf16.msra.mxu1 %v320_v29 }
  0xc4   : > { %v350_v30 = vpop.permute.xlu0 %349  ;;  %610 = vmatprep.subr.bf16.mxu1 %v970_v0 }
  0xc5   : > { %v352_v31 = vpop.permute.xlu1 %351 }
  0xc6   : > { %v357_v32 = vsel %vm355_vm4, %v350_v30, %v352_v31 }
  0xc7   : > { %569 = vmatprep.subr.bf16.mxu0 %v357_v32 }
  0xc8   : > { %v348_v33 = vpop.permute.xlu0 %347 }
  0xc9   : > { %v354_v34 = vpop.permute.xlu1 %353  ;;  %v356_v35 = vsel %vm355_vm4, %v348_v33, %v350_v30 }
  0xca   : > { %570 = vmatpush1.bf16.msra.mxu0 %v356_v35  ;;  %v358_v36 = vsel %vm355_vm4, %v352_v31, %v354_v34 }
  0xcb   : > { %611 = vmatpush1.bf16.msra.mxu1 %v358_v36 }
  0xcc   : > { %v388_v37 = vpop.permute.xlu0 %387  ;;  %612 = vmatprep.subr.bf16.mxu1 %v970_v0 }
  0xcd   : > { %v390_v38 = vpop.permute.xlu1 %389 }
  0xce   : > { %v395_v39 = vsel %vm393_vm5, %v388_v37, %v390_v38 }
  0xcf   : > { %571 = vmatprep.subr.bf16.mxu0 %v395_v39 }
  0xd0   : > { %v386_v40 = vpop.permute.xlu0 %385 }
  0xd1   : > { %v392_v41 = vpop.permute.xlu1 %391  ;;  %v394_v42 = vsel %vm393_vm5, %v386_v40, %v388_v37 }
  0xd2   : > { %572 = vmatpush1.bf16.msra.mxu0 %v394_v42  ;;  %v396_v43 = vsel %vm393_vm5, %v390_v38, %v392_v41 }
  0xd3   : > { %613 = vmatpush1.bf16.msra.mxu1 %v396_v43 }
  0xd4   : > { %v426_v44 = vpop.permute.xlu0 %425  ;;  %614 = vmatprep.subr.bf16.mxu1 %v970_v0 }
  0xd5   : > { %v428_v45 = vpop.permute.xlu1 %427 }
  0xd6   : > { %v433_v46 = vsel %vm431_vm6, %v426_v44, %v428_v45 }
  0xd7   : > { %573 = vmatprep.subr.bf16.mxu0 %v433_v46 }
  0xd8   : > { %v424_v47 = vpop.permute.xlu0 %423 }
  0xd9   : > { %v430_v48 = vpop.permute.xlu1 %429  ;;  %v432_v49 = vsel %vm431_vm6, %v424_v47, %v426_v44 }
  0xda   : > { %574 = vmatpush1.bf16.msra.mxu0 %v432_v49  ;;  %v434_v50 = vsel %vm431_vm6, %v428_v45, %v430_v48 }
  0xdb   : > { %615 = vmatpush1.bf16.msra.mxu1 %v434_v50 }
  0xdc   : > { %v464_v51 = vpop.permute.xlu0 %463  ;;  %616 = vmatprep.subr.bf16.mxu1 %v970_v0 }
  0xdd   : > { %v466_v52 = vpop.permute.xlu1 %465 }
  0xde   : > { %v471_v53 = vsel %vm469_vm7, %v464_v51, %v466_v52 }
  0xdf   : > { %575 = vmatprep.subr.bf16.mxu0 %v471_v53 }
  0xe0   : > { %v462_v54 = vpop.permute.xlu0 %461 }
  0xe1   : > { %v468_v55 = vpop.permute.xlu1 %467  ;;  %v470_v56 = vsel %vm469_vm7, %v462_v54, %v464_v51 }
  0xe2   : > { %576 = vmatpush1.bf16.msra.mxu0 %v470_v56  ;;  %v472_v57 = vsel %vm469_vm7, %v466_v52, %v468_v55 }
  0xe3   : > { %617 = vmatpush1.bf16.msra.mxu1 %v472_v57 }
  0xe4   : > { %v502_v58 = vpop.permute.xlu0 %501  ;;  %618 = vmatprep.subr.bf16.mxu1 %v970_v0 }
  0xe5   : > { %v504_v59 = vpop.permute.xlu1 %503 }
  0xe6   : > { %v509_v60 = vsel %vm507_vm8, %v502_v58, %v504_v59 }
  0xe7   : > { %577 = vmatprep.subr.bf16.mxu0 %v509_v60 }
  0xe8   : > { %v500_v61 = vpop.permute.xlu0 %499 }
  0xe9   : > { %v506_v62 = vpop.permute.xlu1 %505  ;;  %v508_v63 = vsel %vm507_vm8, %v500_v61, %v502_v58 }
  0xea   : > { %578 = vmatpush1.bf16.msra.mxu0 %v508_v63  ;;  %v510_v2 = vsel %vm507_vm8, %v504_v59, %v506_v62 }
  0xeb   : > { %619 = vmatpush1.bf16.msra.mxu1 %v510_v2 }
  0xed   : > { %594 = vmatmul.mubr.bf16.vlgmr.msra.gmra.mrb[0].mxu0 %v788_v1 }
  0xee   : > { %635 = vmatmul.mubr.bf16.vlgmr.msra.gmra.mrb[0].mxu1 %v788_v1 }
  0xf9   : > { %v549_v3 = vpop.permute.xlu0 %548 }
 0x1c0   : > { %v595_v4 = vpop.f32.mrb[0].mxu0 }
 0x1c1   : > { %v596_v5 = vadd.f32 %v595_v4, %v549_v3  ;;  %v636_v0 = vpop.f32.mrb[0].mxu1  ;;  %v597_v7 = vpop.f32.mrb[1].mxu0 }
 0x1c2   : > { %v637_v8 = vadd.f32 %v636_v0, %v549_v3  ;;  %v598_v9 = vadd.f32 %v597_v7, %v549_v3  ;;  %v638_v10 = vpop.f32.mrb[1].mxu1  ;;  %v599_v11 = vpop.f32.mrb[2].mxu0 }
 0x1c3   : > { %v642_v12 = vmax.f32 %v596_v5, 0.0  ;;  %v639_v6 = vpop.f32.mrb[2].mxu1  ;;  %v600_v13 = vpop.f32.mrb[3].mxu0 }
 0x1c4   : > { %v644_v14 = vmax.f32 %v637_v8, 0.0  ;;  %v643_v15 = vmax.f32 %v598_v9, 0.0  ;;  %v640_v16 = vpop.f32.mrb[3].mxu1 }
 0x1c6   : > { %v799_v17 = vpack.c.bf16 %v644_v14, %v644_v14  ;;  %v798_v18 = vpack.c.bf16 %v643_v15, %v642_v12 }
 0x1c8   : > { %659 = vst [vmem:[%s188_s9 + $0x8] sm:$0xf] %v799_v17  ;;  %658 = vst [vmem:[%s188_s9] sm:$0xff] %v798_v18 }
 0x1c9   : > { %912 = shalt.err (!%p909_p2)
}
 0x1ca   : > { %s913_s5 = scalar_lea.hbm %s1139_s23, 192  ;;  %s917_s22 = scalar_lea.hbm %s1186_s3, 384 }
 0x1cb   : > { %p914_p4 = scmp.ne.s32.totalorder %s1139_s23, %s913_s5  ;;  %p918_p9 = scmp.lt.u32.totalorder %s1139_s23, %s1186_s3 }
 0x1cc   : > { %p919_p1 = scmp.lt.u32.totalorder %s917_s22, %s913_s5  ;;  %p921_p6 = scmp.lt.u32.totalorder %s913_s5, %s1139_s23 }
 0x1cd   : > { %p915_p5 = pnand %p914_p4, %p1193_p11 }
 0x1ce   : > { %p920_p3 = por %p919_p1, %p918_p9 }
 0x1cf   : > { %p916_p7 = pneg %p915_p5 }
 0x1d0   : > { %p922_p12 = por %p921_p6, %p920_p3 }
 0x1d2   : > { %p923_p13 = pnand %p922_p12, %p916_p7 }
 0x1d4   : > { %926 = shalt.err (!%p923_p13)
}
 0x1d5   : > { %804 = dma.vmem_to_hbm [thread:$0]  (%p1193_p11), %s1141_s10, 192, %s1139_s23, %s661_s16  }
 0x1d6 PF: > { %s687_s28 = sand.u32 1, %s953_s12   ;;  %p1194_p8 = scmp.ne.s32.totalorder %s1191_s25, 0 }
 0x1d7   : > { %p1195_p10 = scmp.ge.s32.totalorder %s965_s15, 2  ;;  %s688_s29 = scalar_lea.sflag [#allocation5], %s687_s28 }
 0x1d9   : > { %p811_p0 = pnand %p1195_p10, %p1194_p8 }
 0x1db   : > { %948 = dma.done.wait (!%p811_p0), %s688_s29, 192  }
 0x1dc   : > { %950 = vsyncadd (!%p811_p0), %s688_s29, 4294967104  ;;  %p16_p2 = scmp.ge.s32.totalorder %s1025_s18, 4   ;;  %s1196_s12 = smov %s957_s13 }
 0x1dd   : > { %s1197_s13 = smov %s961_s14  ;;  %s1198_s14 = smov %s1037_s21 }
 0x1de   : > { %s1199_s15 = smov %s1025_s18  ;;  %18 = sbr.rel (!%p16_p2) target bundleno = 5 (0x5), region = 77 }
 0x1e5   :  { %693 = vsyncpa [#allocation4], 1 }
 0x1e6   :  { %695 = vsyncpa [#allocation4 + $0x1], 1 }
 0x1e7   :  { %696 = vsyncpa [#allocation5], 1 }
 0x1e8   :  { %698 = vsyncpa [#allocation5 + $0x1], 1 }

</bundles_post_ra>
